<compile_context>
chip_gen: v7x
topology: tpu7x:2x2x1
jax: 0.10.0
libtpu: 0.0.40
codegen_flags: <defaults>
</compile_context>

<pallas_src>
import functools

import jax
import jax.numpy as jnp
from jax.experimental import pallas as pl
from jax.experimental.pallas import tpu as pltpu


_TILE_VMEM_BUDGET = 24 * 1024 * 1024   # pipelined-buffer budget, safe on all gens
_TM_CAP = 1024                         # max rows per tile (multiple of 8)


def _round_up(n, m):
    return ((n + m - 1) // m) * m


def _fan_kernel(x_ref, w_ref, b_ref, o_ref, *, d_p, approximate_gelu):
    # One fused MXU matmul for both branches; f32 accumulation regardless of
    # the staging dtype of x / W.
    y = jnp.dot(x_ref[...], w_ref[...], preferred_element_type=jnp.float32)

    p = y[:, :d_p]                         # periodic pre-activation
    g = y[:, d_p:] + b_ref[...]            # (1, d_p_bar) broadcast, f32

    if approximate_gelu:
        # tanh-approx GELU: uses the EUP tanh slot instead of the erf VALU
        # polynomial.  Slightly diverges from F.gelu's default numerics.
        act = jax.nn.gelu(g, approximate=True)
    else:
        inv_sqrt2 = jnp.float32(0.7071067811865476)
        act = 0.5 * g * (1.0 + jax.lax.erf(g * inv_sqrt2))

    # Direct slice stores (no concatenate repack).  Lane-aligned whole-vreg
    # stores whenever d_p / d_p_bar are multiples of 128.
    o_ref[:, :d_p] = jnp.cos(p).astype(o_ref.dtype)
    o_ref[:, d_p:2 * d_p] = jnp.sin(p).astype(o_ref.dtype)
    o_ref[:, 2 * d_p:] = act.astype(o_ref.dtype)


def fuse_fan_params(W_p, W_p_bar, B_p_bar):
    """Fuse the two projection weights ONCE at parameter-init time.

    Rebuilding the fused weight every forward would re-read both weights and
    write a fresh HBM copy on an already memory-bound op.
    """
    assert W_p.shape[0] == W_p_bar.shape[0]
    assert W_p.dtype == W_p_bar.dtype, "fused weight requires matching dtypes"
    d_p = W_p.shape[1]
    W_all = jnp.concatenate([W_p, W_p_bar], axis=1)        # (K, d_p + d_p_bar)
    b2 = B_p_bar.reshape(1, -1)                            # (1, d_p_bar)
    return W_all, b2, d_p


def fan_layer(x, W_all, b2, d_p, *, tm=None, approximate_gelu=False):
    """x: (..., input_dim) -> (..., 2*d_p + d_p_bar).

    W_all: fused (input_dim, d_p + d_p_bar) weight from fuse_fan_params.
    b2:    (1, d_p_bar) bias.
    For production, pass x / W_all already in bf16 to halve HBM traffic; the
    accumulation and all elementwise math stay f32.
    """
    *lead, K = x.shape
    assert W_all.shape[0] == K
    d_p_bar = W_all.shape[1] - d_p
    D_out = 2 * d_p + d_p_bar
    out_dtype = x.dtype

    x2 = x.reshape(-1, K)
    M = x2.shape[0]

    x_row_bytes = K * x2.dtype.itemsize
    out_row_bytes = D_out * jnp.dtype(out_dtype).itemsize
    # Resident operands (grid-invariant index_map) are still double-buffered
    # by the default pipeline -> budget 2 copies.
    resident_bytes = 2 * (W_all.size * W_all.dtype.itemsize
                          + b2.size * b2.dtype.itemsize)

    if tm is None:
        avail = max(_TILE_VMEM_BUDGET - resident_bytes, 0)
        tm_vmem = (avail // (2 * (x_row_bytes + out_row_bytes))) // 8 * 8
        tm = max(8, min(_TM_CAP, tm_vmem))
        # v7x megacore: keep at least 2 grid steps so both TensorCores get work.
        tm = min(tm, _round_up(pl.cdiv(M, 2), 8))
    tm = max(8, _round_up(tm, 8))

    grid_m = pl.cdiv(M, tm)   # no host-side padding; last block may be partial

    tile_bytes = 2 * tm * (x_row_bytes + out_row_bytes) + resident_bytes
    vmem_limit = int(min(128 * 1024 * 1024,
                         max(32 * 1024 * 1024, tile_bytes + (8 << 20))))

    cost = pl.CostEstimate(
        flops=2 * M * K * (d_p + d_p_bar),
        transcendentals=M * (2 * d_p + d_p_bar),
        bytes_accessed=(M * K * x2.dtype.itemsize
                        + W_all.size * W_all.dtype.itemsize
                        + b2.size * b2.dtype.itemsize
                        + M * D_out * jnp.dtype(out_dtype).itemsize),
    )

    kernel = functools.partial(_fan_kernel, d_p=d_p,
                               approximate_gelu=approximate_gelu)

    out2 = pl.pallas_call(
        kernel,
        out_shape=jax.ShapeDtypeStruct((M, D_out), out_dtype),
        grid_spec=pltpu.PrefetchScalarGridSpec(
            num_scalar_prefetch=0,
            grid=(grid_m,),
            in_specs=[
                pl.BlockSpec((tm, K), lambda i: (i, 0)),                 # x rows
                pl.BlockSpec((K, d_p + d_p_bar), lambda i: (0, 0)),      # fused weight (resident)
                pl.BlockSpec((1, d_p_bar), lambda i: (0, 0)),            # bias (resident)
            ],
            out_specs=pl.BlockSpec((tm, D_out), lambda i: (i, 0)),
        ),
        compiler_params=pltpu.CompilerParams(
            dimension_semantics=("parallel",),
            vmem_limit_bytes=vmem_limit,
        ),
        cost_estimate=cost,
    )(x2, W_all, b2)

    return out2.reshape(*lead, D_out)


def fan_layer_from_params(x, W_p, W_p_bar, B_p_bar, **kwargs):
    """Convenience wrapper; prefer fuse_fan_params() once + fan_layer()."""
    W_all, b2, d_p = fuse_fan_params(W_p, W_p_bar, B_p_bar)
    return fan_layer(x, W_all, b2, d_p, **kwargs)


def _xavier_uniform(key, shape, dtype=jnp.float32):
    fan_in, fan_out = shape[0], shape[1]
    bound = (6.0 / (fan_in + fan_out)) ** 0.5
    return jax.random.uniform(key, shape, dtype, minval=-bound, maxval=bound)


def _reference(x, W_p, W_p_bar, B_p_bar):
    p = x @ W_p
    g = x @ W_p_bar + B_p_bar
    act = 0.5 * g * (1.0 + jax.lax.erf(g / jnp.sqrt(2.0)))
    return jnp.concatenate([jnp.cos(p), jnp.sin(p), act], axis=-1)


if __name__ == "__main__":
    input_dim = 32
    output_dim = 64
    d_p = output_dim // 4              # 16
    d_p_bar = output_dim - 2 * d_p     # 32
    batch, seq = 2, 8

    key = jax.random.PRNGKey(0)
    kx, kwp, kwpb, kx2 = jax.random.split(key, 4)

    x = jax.random.normal(kx, (batch, seq, input_dim), dtype=jnp.float32)
    W_p = _xavier_uniform(kwp, (input_dim, d_p))
    W_p_bar = _xavier_uniform(kwpb, (input_dim, d_p_bar))
    B_p_bar = jnp.zeros((d_p_bar,), dtype=jnp.float32)

    # Fuse once at "init" time (hoisted out of the forward path).
    W_all, b2, d_p_fused = fuse_fan_params(W_p, W_p_bar, B_p_bar)

    out = fan_layer(x, W_all, b2, d_p_fused)
    out = jax.block_until_ready(out)

    ref = _reference(x, W_p, W_p_bar, B_p_bar)
    assert out.shape == (batch, seq, output_dim)
    assert jnp.allclose(out, ref, atol=1e-5, rtol=1e-5)

    # Ragged row count (M = 15 not a multiple of the 8-row tile): exercises
    # the masked partial last block that replaced the host-side pad/slice.
    x_r = jax.random.normal(kx2, (3, 5, input_dim), dtype=jnp.float32)
    out_r = jax.block_until_ready(fan_layer(x_r, W_all, b2, d_p_fused))
    ref_r = _reference(x_r, W_p, W_p_bar, B_p_bar)
    assert out_r.shape == (3, 5, output_dim)
    assert jnp.allclose(out_r, ref_r, atol=1e-5, rtol=1e-5)

    print("KERNEL_OK")
</pallas_src>

<mosaic_0001>
module attributes {stable_mosaic.version = 11 : i64} {
  func.func @_fan_kernel(%arg0: i32, %arg1: memref<8x32xf32, #tpu.memory_space<vmem>>, %arg2: memref<32x48xf32, #tpu.memory_space<vmem>>, %arg3: memref<1x32xf32, #tpu.memory_space<vmem>>, %arg4: memref<8x64xf32, #tpu.memory_space<vmem>>) attributes {dimension_semantics = [#tpu.dimension_semantics<parallel>], iteration_bounds = array<i64: 2>, scalar_prefetch = 0 : i64, scratch_operands = 0 : i64, tpu.core_type = #tpu.core_type<tc>, window_params = [{transform_indices = @transform_0, window_bounds = array<i64: 8, 32>}, {pipeline_mode = #tpu.pipeline_mode<synchronous>, transform_indices = @transform_1, window_bounds = array<i64: 32, 48>}, {pipeline_mode = #tpu.pipeline_mode<synchronous>, transform_indices = @transform_2, window_bounds = array<i64: 1, 32>}, {transform_indices = @transform_3, window_bounds = array<i64: 8, 64>}]} {
    %c0 = arith.constant 0 : index
    %c0_0 = arith.constant 0 : index
    %0 = vector.load %arg1[%c0, %c0_0] : memref<8x32xf32, #tpu.memory_space<vmem>>, vector<8x32xf32>
    %c0_1 = arith.constant 0 : index
    %c0_2 = arith.constant 0 : index
    %1 = vector.load %arg2[%c0_1, %c0_2] : memref<32x48xf32, #tpu.memory_space<vmem>>, vector<32x48xf32>
    %cst = arith.constant dense<0.000000e+00> : vector<8x48xf32>
    %2 = tpu.matmul %0, %1, %cst {dimension_numbers = #tpu.dot_dimension_numbers<[1], [0], [0], [1], [0, 0, 1, 1], [], []>} : vector<8x32xf32>, vector<32x48xf32>, vector<8x48xf32> -> vector<8x48xf32>
    %3 = vector.extract_strided_slice %2 {offsets = [0, 0], sizes = [8, 16], strides = [1, 1]} : vector<8x48xf32> to vector<8x16xf32>
    %4 = vector.extract_strided_slice %2 {offsets = [0, 16], sizes = [8, 32], strides = [1, 1]} : vector<8x48xf32> to vector<8x32xf32>
    %c0_3 = arith.constant 0 : index
    %c0_4 = arith.constant 0 : index
    %5 = vector.load %arg3[%c0_3, %c0_4] : memref<1x32xf32, #tpu.memory_space<vmem>>, vector<1x32xf32>
    %6 = vector.broadcast %5 : vector<1x32xf32> to vector<8x32xf32>
    %7 = arith.addf %4, %6 : vector<8x32xf32>
    %cst_5 = arith.constant 5.000000e-01 : f32
    %8 = vector.broadcast %cst_5 : f32 to vector<8x32xf32>
    %9 = arith.mulf %8, %7 : vector<8x32xf32>
    %cst_6 = arith.constant 0.707106769 : f32
    %10 = vector.broadcast %cst_6 : f32 to vector<8x32xf32>
    %11 = arith.mulf %7, %10 : vector<8x32xf32>
    %12 = math.erf %11 : vector<8x32xf32>
    %cst_7 = arith.constant 1.000000e+00 : f32
    %13 = vector.broadcast %cst_7 : f32 to vector<8x32xf32>
    %14 = arith.addf %13, %12 : vector<8x32xf32>
    %15 = arith.mulf %9, %14 : vector<8x32xf32>
    %16 = math.cos %3 : vector<8x16xf32>
    %c0_8 = arith.constant 0 : index
    %c0_9 = arith.constant 0 : index
    %17 = vector.load %arg4[%c0_8, %c0_9] : memref<8x64xf32, #tpu.memory_space<vmem>>, vector<8x16xf32>
    tpu.vector_store %arg4[%c0_8, %c0_9], %16 {strides = array<i32>} : memref<8x64xf32, #tpu.memory_space<vmem>>, vector<8x16xf32>,
    %18 = math.sin %3 : vector<8x16xf32>
    %c0_10 = arith.constant 0 : index
    %c16 = arith.constant 16 : index
    %19 = vector.load %arg4[%c0_10, %c16] : memref<8x64xf32, #tpu.memory_space<vmem>>, vector<8x16xf32>
    tpu.vector_store %arg4[%c0_10, %c16], %18 {strides = array<i32>} : memref<8x64xf32, #tpu.memory_space<vmem>>, vector<8x16xf32>,
    %c0_11 = arith.constant 0 : index
    %c32 = arith.constant 32 : index
    %20 = vector.load %arg4[%c0_11, %c32] : memref<8x64xf32, #tpu.memory_space<vmem>>, vector<8x32xf32>
    tpu.vector_store %arg4[%c0_11, %c32], %15 {strides = array<i32>} : memref<8x64xf32, #tpu.memory_space<vmem>>, vector<8x32xf32>,
    return
  }
  func.func @transform_0(%arg0: i32) -> (i32, i32) {
    %c0_i32 = arith.constant 0 : i32
    %c0_i32_0 = arith.constant 0 : i32
    return %arg0, %c0_i32 : i32, i32
  }
  func.func @transform_1(%arg0: i32) -> (i32, i32) {
    %c0_i32 = arith.constant 0 : i32
    %c0_i32_0 = arith.constant 0 : i32
    %c0_i32_1 = arith.constant 0 : i32
    return %c0_i32, %c0_i32_0 : i32, i32
  }
  func.func @transform_2(%arg0: i32) -> (i32, i32) {
    %c0_i32 = arith.constant 0 : i32
    %c0_i32_0 = arith.constant 0 : i32
    %c0_i32_1 = arith.constant 0 : i32
    return %c0_i32, %c0_i32_0 : i32, i32
  }
  func.func @transform_3(%arg0: i32) -> (i32, i32) {
    %c0_i32 = arith.constant 0 : i32
    %c0_i32_0 = arith.constant 0 : i32
    return %arg0, %c0_i32 : i32, i32
  }
}

</mosaic_0001>

<bundles_post_ra>
// kernel: tpu_custom_call.1
= control target key start
LH: loop header
LB: loop body
LE: loop exit
PB: predicated region body
PF: predicated region fallthrough
CT: control target
= control target key end

     0   :  { %8 = vsyncpa [#allocation3], 0  ;;  %s1129_s0 = inlined_call_operand.hbm [shape: f32[16,32], index: 0, kind: input, shape index: {}]   ;;  %s1130_s1 = inlined_call_operand.hbm [shape: f32[32,48], index: 1, kind: input, shape index: {}]   ;;  %s1131_s2 = inlined_call_operand.vmem [shape: f32[1,32], index: 2, kind: input, shape index: {}]   ;;  %s1132_s3 = inlined_call_operand.hbm [shape: f32[16,64], index: 3, kind: output, shape index: {}]  }
   0x1   :  { %10 = vsyncpa [#allocation3 + $0x1], 0 }
   0x2   :  { %11 = vsyncpa [#allocation6], 0 }
   0x3   :  { %12 = vsyncpa [#allocation4], 0 }
   0x4   :  { %14 = vsyncpa [#allocation4 + $0x1], 0  ;;  %s900_s12 = smov 0   ;;  %s902_s13 = smov 0  }
   0x5   :  { %s904_s14 = smov 0   ;;  %s906_s15 = smov 0  }
   0x6 LB: > { %s921_s16 = sadd.s32 4294967295, %s863_s15   ;;  %s610_s17 = sadd.s32 4294967294, %s863_s15   ;;  %s863_s15 = sphi %s906_s15, %s1152_s15   ;;  %s859_s14 = sphi %s904_s14, %s1151_s14   ;;  %s855_s13 = sphi %s902_s13, %s1150_s13   ;;  %s851_s12 = sphi %s900_s12, %s1149_s12  }
   0x7   : > { %p40_p0 = scmp.ne.s32.totalorder %s855_s13, %s851_s12  ;;  %p1133_p1 = scmp.eq.s32.totalorder %s921_s16, 0 }
   0x8   : > { %p112_p3 = scmp.eq.s32.totalorder %s610_s17, 1  ;;  %p611_p5 = scmp.ge.s32.totalorder %s863_s15, 1 }
   0x9   : > { %p930_p4 = por %p1133_p1, %p40_p0  ;;  %p119_p7 = scmp.lt.s32.totalorder %s863_s15, 3 }
   0xa   : > { %p935_p6 = por %p112_p3, %p40_p0  ;;  %s865_s21 = smov [#allocation5]  }
   0xb   : > { %s1136_s18 = scalar_select %p930_p4, 1, 0 }
   0xc   : > { %s1137_s19 = scalar_select %p935_p6, 1, 0 }
   0xd   : > { %p940_p8 = pnand %p611_p5, %p119_p7  ;;  %s131_s22 = sshll.u32 %s865_s21, 4  ;;  %s944_s22 = int_to_ptr.vmem [resolvable:$true] %s131_s22 }
   0xe   : > { %s956_s24 = sadd.s32 1, %s863_s15   ;;  %s27_s25 = sadd.s32 1, %s859_s14 }
   0xf   : > { %s1138_s20 = scalar_select %p940_p8, 1, 0 }
  0x10   : > { %p668_p9 = pneg %p940_p8  ;;  %s24_s26 = ssub.s32 %s863_s15, %s956_s24 }
  0x11   : > { %s735_s29 = scalar_lea.hbm %s1130_s1, 512 }
  0x12   : > { %p951_p11 = pnand %p668_p9, %p1133_p1  ;;  %p736_p12 = scmp.ne.s32.totalorder %s1130_s1, %s735_s29 }
  0x13   : > { %p742_p5 = scmp.lt.u32.totalorder %s735_s29, %s1130_s1 }
  0x14   : > { %p737_p13 = pneg %p951_p11 }
  0x16   : > { %p738_p0 = pnand %p737_p13, %p736_p12 }
  0x18   : > { %p739_p3 = pneg %p738_p0 }
  0x1a   : > { %p744_p7 = pnand %p742_p5, %p739_p3 }
  0x1c   : > { %747 = shalt.err (!%p744_p7)
}
  0x1d   : > { %s748_s7 = scalar_lea.vmem %s944_s22, 512  ;;  %p756_p2 = scmp.lt.s32.totalorder %s944_s22, %s944_s22 }
  0x1e   : > { %p749_p9 = scmp.ne.s32.totalorder %s944_s22, %s748_s7  ;;  %p757_p6 = scmp.lt.s32.totalorder %s748_s7, %s748_s7 }
  0x20   : > { %p751_p10 = pnand %p749_p9, %p737_p13  ;;  %p758_p4 = por %p757_p6, %p756_p2 }
  0x22   : > { %p752_p1 = pneg %p751_p10 }
  0x24   : > { %p759_p8 = pnand %p758_p4, %p752_p1 }
  0x26   : > { %762 = shalt.err (!%p759_p8)
}
  0x27   : > { %s866_s8 = smov 128   ;;  %s867_s9 = smov 8  }
  0x28   : > { %671 = dma.hbm_to_vmem [thread:$0]  (!%p951_p11), %s1130_s1, 512, %s944_s22, [#allocation6], %s866_s8, %s866_s8, %s867_s9  }
  0x29   : > { %p25_p2 = scmp.eq.s32.totalorder %s24_s26, 0  ;;  %p34_p1 = scmp.ne.s32.totalorder %s859_s14, %s855_s13 }
  0x2a   : > { %p35_p4 = scmp.eq.s32.totalorder %s863_s15, 0  ;;  %p681_p6 = scmp.lt.s32.totalorder %s863_s15, 2 }
  0x2b   : > { %s987_s17 = scalar_select %p25_p2, %s859_s14, %s27_s25  }
  0x2c   : > { %p36_p8 = por %p35_p4, %p34_p1  ;;  %p1140_p10 = scmp.eq.s32.totalorder %s921_s16, 1 }
  0x2d   : > { %s148_s27 = sand.u32 1, %s859_s14   ;;  %s615_s28 = sshll.u32 %s863_s15, 7 }
  0x2e   : > { %p991_p12 = por %p1140_p10, %p34_p1  ;;  %s614_s29 = sshll.u32 %s148_s27, 3 }
  0x2f   : > { %s1000_s4 = scalar_lea.hbm %s1129_s0, %s615_s28  ;;  %s152_s22 = scalar_lea.vmem [#allocation2], %s614_s29 }
  0x30   : > { %s159_s25 = sshll.u32 %s152_s22, 4  ;;  %p1002_p11 = pnand %p681_p6, %p36_p8  ;;  %s1006_s25 = int_to_ptr.vmem [resolvable:$true] %s159_s25 }
  0x31   : > { %s149_s5 = scalar_lea.sflag [#allocation3], %s148_s27  ;;  %s763_s6 = scalar_lea.hbm %s1000_s4, 128 }
  0x32   : > { %p764_p13 = scmp.ne.s32.totalorder %s1000_s4, %s763_s6  ;;  %p765_p0 = pneg %p1002_p11 }
  0x33   : > { %s768_s9 = scalar_lea.hbm %s1129_s0, 256  ;;  %p769_p7 = scmp.lt.u32.totalorder %s1000_s4, %s1129_s0 }
  0x34   : > { %p766_p3 = pnand %p765_p0, %p764_p13  ;;  %p770_p9 = scmp.lt.u32.totalorder %s768_s9, %s763_s6 }
  0x35   : > { %p772_p1 = scmp.lt.u32.totalorder %s763_s6, %s1000_s4 }
  0x36   : > { %p767_p5 = pneg %p766_p3  ;;  %p771_p2 = por %p770_p9, %p769_p7 }
  0x38   : > { %p773_p4 = por %p772_p1, %p771_p2 }
  0x3a   : > { %p774_p6 = pnand %p773_p4, %p767_p5 }
  0x3c   : > { %777 = shalt.err (!%p774_p6)
}
  0x3d   : > { %s778_s27 = scalar_lea.vmem %s1006_s25, 128  ;;  %s868_s28 = smov [#allocation2]  }
  0x3e   : > { %p779_p8 = scmp.ne.s32.totalorder %s1006_s25, %s778_s27  ;;  %s783_s29 = sshll.u32 %s868_s28, 4  ;;  %s784_s29 = int_to_ptr.vmem [resolvable:$false] %s783_s29 }
  0x3f   : > { %s785_s23 = scalar_lea.vmem %s784_s29, 256  ;;  %p786_p3 = scmp.lt.s32.totalorder %s1006_s25, %s784_s29 }
  0x40   : > { %p781_p10 = pnand %p779_p8, %p765_p0  ;;  %p787_p7 = scmp.lt.s32.totalorder %s785_s23, %s778_s27 }
  0x42   : > { %p782_p13 = pneg %p781_p10  ;;  %p788_p9 = por %p787_p7, %p786_p3 }
  0x44   : > { %p789_p2 = pnand %p788_p9, %p782_p13 }
  0x46   : > { %792 = shalt.err (!%p789_p2)
}
  0x47   : > { %675 = dma.hbm_to_vmem [thread:$0]  (!%p1002_p11), %s1000_s4, 128, %s1006_s25, %s149_s5  }
  0x48   : > { %p1143_p5 = scmp.ne.s32.totalorder %s1138_s20, 0 }
  0x49   : > { %s1036_s30 = sand.u32 (!%p1143_p5), 1, %s855_s13   ;;  %p1144_p0 = scmp.ne.s32.totalorder (!%p1143_p5), %s1136_s18, 0 }
  0x4a   : > { %168 = sbr.rel (%p1143_p5) target bundleno = 516 (0x204), region = 32  ;;  %s617_s22 = sshll.u32 (!%p1143_p5), %s1036_s30, 3 }
  0x4b   : > { %s171_s6 = scalar_lea.sflag (!%p1143_p5), [#allocation3], %s1036_s30  ;;  %s174_s7 = scalar_lea.vmem (!%p1143_p5), [#allocation2], %s617_s22 }
  0x51   : > { %838 = dma.done.wait (%p1144_p0), %s171_s6, 128  }
  0x52   : > { %840 = vsyncadd (%p1144_p0), %s171_s6, 4294967168  ;;  %p1145_p11 = scmp.eq.s32.totalorder %s921_s16, 0 }
  0x54   : > { %842 = dma.done.wait (%p1145_p11), [#allocation6], 512   ;;  %p1146_p1 = pmov %p1145_p11 }
  0x55   : > { %v869_v0 = vmov 0.0|0.0   ;;  %vm870_vm0 = vmmov 0   ;;  %v871_v1 = vmov 0.0   ;;  %v202_v2 = vld [vmem:[#allocation5] sm:$0xff]  ;;  %v203_v3 = vld [vmem:[#allocation5 + $0x8] sm:$0xff]  ;;  %v204_v4 = vld [vmem:[#allocation5 + $0x10] sm:$0xff] }
  0x56   : > { %844 = vsyncadd (%p1146_p1), [#allocation6], 4294966784  ;;  %650 = vmatprep.subr.bf16.mxu0 %v869_v0  ;;  %647 = vmatprep.mubr.msk.f32.mxu0 %vm870_vm0, %v871_v1  ;;  %v651_v5 = vpack.c.bf16 %v203_v3, %v202_v2  ;;  %v205_v6 = vld [vmem:[#allocation5 + $0x18] sm:$0xff]  ;;  %v621_v7 = vld [vmem:[%s1131_s2] ss:$0 sm:$0xff]  ;;  %s872_s18 = smov 16  }
  0x57   : > { %286 = vrot.lane.b32.xlu0 %v621_v7, %s872_s18  ;;  %v654_v8 = vpack.c.bf16 %v205_v6, %v204_v4  ;;  %v201_v9 = vld [vmem:[%s174_s7] sm:$0xff]  ;;  %vm206_vm1 = vcmask 261120   ;;  %v873_v27 = vmov 683565275   ;;  %v874_v29 = vmov 2475754826  }
  0x58   : > { %652 = vmatpush3.bf16.msra.mxu0 %v651_v5  ;;  %v875_v32 = vmov 2131351028   ;;  %v876_v35 = vmov 2102212464   ;;  %v877_v39 = vmov 920167782  }
  0x59   : > { %653 = vmatprep.subr.bf16.mxu0 %v869_v0  ;;  %v878_v42 = vmov 1326507024   ;;  %vm398_vm12 = vcmask 130048   ;;  %s200_s25 = scalar_lea.vmem [#allocation7], %s617_s22  ;;  %s631_s26 = sshll.u32 %s921_s16, 7 }
  0x5a   : > { %s530_s5 = sshll.u32 %s200_s25, 4  ;;  %s1085_s10 = scalar_lea.hbm %s1132_s3, %s631_s26  ;;  %s1087_s5 = int_to_ptr.vmem [resolvable:$true] %s530_s5 }
  0x5b   : > { %s517_s11 = scalar_lea.sflag [#allocation4], %s1036_s30  ;;  %s793_s27 = scalar_lea.vmem %s1087_s5, 128 }
  0x5c   : > { %655 = vmatpush3.bf16.msra.mxu0 %v654_v8  ;;  %p794_p4 = scmp.ne.s32.totalorder %s1087_s5, %s793_s27  ;;  %s879_s16 = smov [#allocation7]  }
  0x5d   : > { %s797_s28 = sshll.u32 %s879_s16, 4  ;;  %s798_s28 = int_to_ptr.vmem [resolvable:$false] %s797_s28 }
  0x5e   : > { %p795_p6 = pnand %p794_p4, %p991_p12  ;;  %s799_s29 = scalar_lea.vmem %s798_s28, 256 }
  0x5f   : > { %648 = vmatmul.mubr.msk.f32.vlgmr.msra.gmra.mrb[0].mxu0 %vm206_vm1, %v201_v9  ;;  %p800_p10 = scmp.lt.s32.totalorder %s1087_s5, %s798_s28  ;;  %p801_p13 = scmp.lt.s32.totalorder %s799_s29, %s793_s27 }
  0x60   : > { %p796_p8 = pneg %p795_p6 }
  0x61   : > { %p802_p3 = por %p801_p13, %p800_p10 }
  0x63   : > { %p803_p7 = pnand %p802_p3, %p796_p8 }
  0xc9   : > { %v287_v10 = vpop.permute.xlu0 %286 }
 0x132   : > { %v1054_v11 = vpop.f32.mrb[0].mxu0 }
 0x133   : > { %v298_v12 = vand.u32 2139095040, %v1054_v11  ;;  %v649_v13 = vpop.f32.mrb[1].mxu0  ;;  %v289_v14 = vadd.f32 %v287_v10, %v1054_v11  ;;  %v295_v18 = vand.u32 2147483647, %v1054_v11  ;;  %vm297_vm9 = vcmp.lt.s32.totalorder %v1054_v11, 0 }
 0x135   : > { %v299_v15 = vshrl.u32 %v298_v12, 23  ;;  %v291_v16 = vmul.f32 0.70710677, %v289_v14  ;;  %v302_v20 = vand.u32 8388607, %v295_v18  ;;  %v290_v24 = vmul.f32 0.5, %v289_v14 }
 0x136   : > { %vm296_vm10 = vcmp.le.f32.partialorder %v295_v18, 0.7853982 }
 0x137   : > { %v622_v17 = vadd.s32 4294967169, %v299_v15  ;;  %729 = verf.f32 %v291_v16  ;;  %v303_v25 = vor.u32 8388608, %v302_v20 }
 0x139   : > { %v305_v19 = vadd.s32 1, %v622_v17  ;;  %v343_v59 = vshll.u32 %v303_v25, 8 }
 0x13b   : > { %vm306_vm2 = vcmp.gt.s32.totalorder %v305_v19, 0 }
 0x13c   : > { %v307_v21 = vsel %vm306_vm2, %v305_v19, 0  ;;  %vm387_vm2 = vweird.f32 %v1054_v11 }
 0x13d   : > { %v309_v22 = vand.u32 31, %v307_v21  ;;  %v308_v26 = vshrl.u32 %v307_v21, 5 }
 0x13f   : > { %v310_v23 = vsub.s32 32, %v309_v22  ;;  %v312_v28 = vshll.u32 %v873_v27, %v309_v22  ;;  %v315_v30 = vshll.u32 %v874_v29, %v309_v22  ;;  %v318_v34 = vshll.u32 %v875_v32, %v309_v22 }
 0x140   : > { %v321_v38 = vshll.u32 %v876_v35, %v309_v22  ;;  %v324_v41 = vshll.u32 %v877_v39, %v309_v22  ;;  %vm327_vm3 = vcmp.lt.s32.totalorder %v308_v26, 1  ;;  %vm330_vm4 = vcmp.lt.s32.totalorder %v308_v26, 4 }
 0x141   : > { %v313_v31 = vshrl.u32 %v874_v29, %v310_v23  ;;  %v316_v33 = vshrl.u32 %v875_v32, %v310_v23  ;;  %v319_v36 = vshrl.u32 %v876_v35, %v310_v23  ;;  %v730_v37 = vpop.eup %729  ;;  %v322_v40 = vshrl.u32 %v877_v39, %v310_v23 }
 0x142   : > { %v325_v43 = vshrl.u32 %v878_v42, %v310_v23  ;;  %v293_v47 = vadd.f32 1.0, %v730_v37  ;;  %v311_v50 = vshrl.u32 %v873_v27, %v310_v23  ;;  %vm329_vm5 = vcmp.lt.s32.totalorder %v308_v26, 3 }
 0x143   : > { %v314_v44 = vor.u32 %v313_v31, %v312_v28  ;;  %v317_v45 = vor.u32 %v316_v33, %v315_v30  ;;  %v320_v46 = vor.u32 %v319_v36, %v318_v34  ;;  %v323_v48 = vor.u32 %v322_v40, %v321_v38 }
 0x144   : > { %v326_v49 = vor.u32 %v325_v43, %v324_v41  ;;  %v294_v56 = vmul.f32 %v293_v47, %v290_v24  ;;  %vm328_vm6 = vcmp.lt.s32.totalorder %v308_v26, 2 }
 0x145   : > { %v332_v51 = vsel %vm330_vm4, %v320_v46, 2102212464  ;;  %v335_v52 = vsel %vm327_vm3, %v314_v44, %v317_v45  ;;  %v339_v53 = vsel %vm327_vm3, %v317_v45, %v320_v46  ;;  %v336_v54 = vsel %vm330_vm4, %v323_v48, 920167782 }
 0x146   : > { %v340_v55 = vsel %vm330_vm4, %v326_v49, 1326507024  ;;  %v337_v57 = vsel %vm329_vm5, %v320_v46, %v336_v54  ;;  %v331_v60 = vsel %vm327_vm3, %v311_v50, %v314_v44  ;;  %v333_v61 = vsel %vm329_vm5, %v317_v45, %v332_v51  ;;  %511 = vrot.lane.b32.xlu1 %v294_v56, %s872_s18 }
 0x147   : > { %v341_v58 = vsel %vm329_vm5, %v323_v48, %v340_v55  ;;  %v338_v62 = vsel %vm328_vm6, %v335_v52, %v337_v57  ;;  %v334_v4 = vsel %vm328_vm6, %v331_v60, %v333_v61  ;;  %vm508_vm3 = vcmask 261248  }
 0x148   : > { %v342_v63 = vsel %vm328_vm6, %v339_v53, %v341_v58  ;;  %v1065_v2 = vmul.u32.u64.low %v343_v59, %v338_v62  ;;  %v1066_v3 = vmul.u32.u64.high %v343_v59, %v338_v62, %v1065_v2  ;;  %v350_v6 = vmul.u32 %v343_v59, %v334_v4 }
 0x149   : > { %v1062_v0 = vmul.u32.u64.low %v343_v59, %v342_v63  ;;  %v1063_v1 = vmul.u32.u64.high %v343_v59, %v342_v63, %v1062_v0  ;;  %vm514_vm4 = vcmask 523520  }
 0x14a   : > { %v353_v5 = vadd.s32 1, %v1066_v3 }
 0x14b   : > { %vm352_vm7 = vc.u32 %v1063_v1, %v1065_v2  ;;  %v351_v20 = vadd.s32 %v1065_v2, %v1063_v1 }
 0x14c   : > { %v354_v7 = vsel %vm352_vm7, %v353_v5, %v1066_v3 }
 0x14d   : > { %v355_v8 = vadd.s32 %v354_v7, %v350_v6 }
 0x14f   : > { %v356_v9 = vadd.s32 536870912, %v355_v8 }
 0x151   : > { %v357_v10 = vshrl.u32 %v356_v9, 30 }
 0x153   : > { %v358_v12 = vshll.u32 %v357_v10, 30  ;;  %v381_v32 = vsub.s32 4, %v357_v10 }
 0x155   : > { %v359_v13 = vsub.s32 %v355_v8, %v358_v12  ;;  %v382_v35 = vsel %vm297_vm9, %v381_v32, %v357_v10 }
 0x156   : > { %v384_v37 = vsel %vm296_vm10, 0, %v382_v35 }
 0x157   : > { %v361_v14 = vsub.s32 0, %v359_v13  ;;  %v493_v38 = vadd.s32 3, %v384_v37  ;;  %v388_v39 = vand.u32 3, %v384_v37 }
 0x159   : > { %v623_v15 = vmin.u32 %v361_v14, %v359_v13  ;;  %v494_v40 = vand.u32 3, %v493_v38  ;;  %vm393_vm11 = vcmp.eq.s32.totalorder %v388_v39, 2  ;;  %vm390_vm14 = vcmp.eq.s32.totalorder %v388_v39, 0 }
 0x15a   : > { %vm389_vm0 = vcmp.lt.s32.totalorder %v388_v39, 2 }
 0x15b   : > { %v363_v16 = vclz %v623_v15  ;;  %vm499_vm13 = vcmp.eq.s32.totalorder %v494_v40, 2  ;;  %vm496_vm15 = vcmp.eq.s32.totalorder %v494_v40, 0  ;;  %vm495_vm1 = vcmp.lt.s32.totalorder %v494_v40, 2 }
 0x15d   : > { %v624_v17 = vadd.s32 4294967294, %v363_v16 }
 0x15f   : > { %vm625_vm8 = vcmp.lt.s32.totalorder %v624_v17, 0 }
 0x160   : > { %v366_v19 = vsel %vm625_vm8, 0, %v624_v17 }
 0x161   : > { %v367_v21 = vsub.s32 32, %v366_v19  ;;  %v371_v22 = vsub.s32 4294967266, %v366_v19  ;;  %v368_v23 = vshll.u32 %v359_v13, %v366_v19 }
 0x163   : > { %v369_v24 = vshrl.u32 %v351_v20, %v367_v21  ;;  %v372_v25 = vadd.s32 127, %v371_v22 }
 0x165   : > { %v370_v26 = vor.u32 %v369_v24, %v368_v23  ;;  %v373_v27 = vshll.u32 %v372_v25, 23 }
 0x167   : > { %v374_v28 = vor.u32 4788187, %v373_v27  ;;  %v377_v30 = vcvt.s32.f32 %v370_v26 }
 0x169   : > { %v375_v29 = vand.u32 2147483647, %v374_v28 }
 0x16b   : > { %v378_v31 = vmul.f32 %v377_v30, %v375_v29 }
 0x16d   : > { %v379_v33 = vxor.u32 2147483648, %v378_v31 }
 0x16f   : > { %v380_v34 = vsel %vm297_vm9, %v379_v33, %v378_v31 }
 0x170   : > { %v383_v36 = vsel %vm296_vm10, %v1054_v11, %v380_v34 }
 0x171   : > { %731 = vcosq.f32 %v383_v36 }
 0x172   : > { %733 = vsinq.f32 %v383_v36 }
 0x17b   : > { %v732_v41 = vpop.eup %731 }
 0x17c   : > { %v734_v42 = vpop.eup %733  ;;  %v394_v43 = vxor.u32 2147483648, %v732_v41 }
 0x17d   : > { %v391_v44 = vxor.u32 2147483648, %v734_v42 }
 0x17e   : > { %v501_v18 = vsel %vm499_vm13, %v394_v43, %v734_v42  ;;  %v395_v45 = vsel %vm393_vm11, %v394_v43, %v734_v42 }
 0x17f   : > { %v498_v46 = vsel %vm496_vm15, %v732_v41, %v391_v44  ;;  %v392_v47 = vsel %vm390_vm14, %v732_v41, %v391_v44 }
 0x180   : > { %v502_v48 = vsel %vm495_vm1, %v498_v46, %v501_v18  ;;  %v396_v49 = vsel %vm389_vm0, %v392_v47, %v395_v45 }
 0x181   : > { %v503_v50 = vsel %vm387_vm2, nan, %v502_v48  ;;  %v397_v51 = vsel %vm387_vm2, nan, %v396_v49 }
 0x182   : > { %505 = vrot.lane.b32.xlu0 %v503_v50, %s872_s18  ;;  %399 = vst.msk [vmem:[%s200_s25] sm:$0xff] %vm398_vm12, %v397_v51 }
 0x1b8   : > { %v512_v11 = vpop.permute.xlu1 %511 }
 0x1f4   : > { %v506_v52 = vpop.permute.xlu0 %505 }
 0x1f5   : > { %509 = vst.msk [vmem:[%s200_s25] sm:$0xff] %vm508_vm3, %v506_v52 }
 0x1f6   : > { %515 = vst.msk [vmem:[%s200_s25] sm:$0xff] %vm514_vm4, %v512_v11 }
 0x1f7   : > { %806 = shalt.err (!%p803_p7)
}
 0x1f8   : > { %s807_s23 = scalar_lea.hbm %s1085_s10, 128  ;;  %s811_s6 = scalar_lea.hbm %s1132_s3, 256 }
 0x1f9   : > { %p808_p9 = scmp.ne.s32.totalorder %s1085_s10, %s807_s23  ;;  %p812_p0 = scmp.lt.u32.totalorder %s1085_s10, %s1132_s3 }
 0x1fa   : > { %p813_p11 = scmp.lt.u32.totalorder %s811_s6, %s807_s23  ;;  %p815_p4 = scmp.lt.u32.totalorder %s807_s23, %s1085_s10 }
 0x1fb   : > { %p809_p2 = pnand %p808_p9, %p991_p12 }
 0x1fc   : > { %p814_p1 = por %p813_p11, %p812_p0 }
 0x1fd   : > { %p810_p5 = pneg %p809_p2 }
 0x1fe   : > { %p816_p6 = por %p815_p4, %p814_p1 }
 0x200   : > { %p817_p8 = pnand %p816_p6, %p810_p5 }
 0x202   : > { %820 = shalt.err (!%p817_p8)
}
 0x203   : > { %666 = dma.vmem_to_hbm [thread:$0]  (%p991_p12), %s1087_s5, 128, %s1085_s10, %s517_s11  }
 0x204 PF: > { %s542_s4 = sand.u32 1, %s851_s12   ;;  %p1147_p10 = scmp.ne.s32.totalorder %s1137_s19, 0 }
 0x205   : > { %p1148_p13 = scmp.ge.s32.totalorder %s863_s15, 2  ;;  %s543_s18 = scalar_lea.sflag [#allocation4], %s542_s4 }
 0x207   : > { %p677_p3 = pnand %p1148_p13, %p1147_p10 }
 0x209   : > { %846 = dma.done.wait (!%p677_p3), %s543_s18, 128  }
 0x20a   : > { %848 = vsyncadd (!%p677_p3), %s543_s18, 4294967168  ;;  %p17_p7 = scmp.ge.s32.totalorder %s956_s24, 4   ;;  %s1149_s12 = smov %s855_s13 }
 0x20b   : > { %s1150_s13 = smov %s859_s14  ;;  %s1151_s14 = smov %s987_s17 }
 0x20c   : > { %s1152_s15 = smov %s956_s24  ;;  %19 = sbr.rel (!%p17_p7) target bundleno = 6 (0x6), region = 81 }
 0x213   :  { %548 = vsyncpa [#allocation3], 1 }
 0x214   :  { %550 = vsyncpa [#allocation3 + $0x1], 1 }
 0x215   :  { %551 = vsyncpa [#allocation6], 1 }
 0x216   :  { %552 = vsyncpa [#allocation4], 1 }
 0x217   :  { %554 = vsyncpa [#allocation4 + $0x1], 1 }

</bundles_post_ra>
